<compile_context>
chip_gen: v6e
topology: v6e:2x2x1
jax: 0.10.0
libtpu: 0.0.40
codegen_flags: <defaults>
</compile_context>

<pallas_src>
import jax
import jax.numpy as jnp
from jax.experimental import pallas as pl
from jax.experimental.pallas import tpu as pltpu


def _linear_kernel(x_ref, w_ref, b_ref, o_ref):
    x = x_ref[...]                       # (d_in, tile_n) f32, VMEM, lane-dense
    w = w_ref[...]                       # (d_in, 1)      f32, VMEM
    b = b_ref[0, 0]                      # scalar         f32, SMEM
    # VPU multiply (broadcast w over lanes) + cross-sublane reduce (XLU).
    acc = jnp.sum(x * w, axis=0, keepdims=True)   # (1, tile_n) f32
    o_ref[...] = acc + b                 # lane-dense slab store


def linear_forward(x, weight, bias, *, tile_n=65536):
    """nn.Linear(13, 1) forward: out = x @ weight.T + bias.

    x:      (N, 13) f32
    weight: (1, 13) f32  (PyTorch layout)
    bias:   (1,)    f32
    returns (N, 1)  f32
    """
    n, d_in = x.shape
    d_out, d_in_w = weight.shape
    assert d_in == d_in_w and d_out == 1

    # Feature-major presentation for lane-dense streaming.  This transpose is
    # layout plumbing; an upstream feature-major x would make it free.
    x_t = x.T                                   # (d_in, N)
    w_col = weight.reshape(d_in, 1).astype(jnp.float32)   # (13, 1)
    b2d = bias.reshape(1, 1).astype(jnp.float32)

    # Tile sizing: big tiles amortize the ~0.35 us per-grid-step overhead.
    # Small batches collapse to one full block; otherwise keep the lane dim a
    # multiple of 128 so blocks satisfy the (8, 128) constraint.
    if n <= tile_n:
        tile_n = n
    else:
        tile_n = max(128, (tile_n // 128) * 128)
    grid = (pl.cdiv(n, tile_n),)

    out = pl.pallas_call(
        _linear_kernel,
        out_shape=jax.ShapeDtypeStruct((1, n), jnp.float32),
        grid_spec=pl.GridSpec(
            grid=grid,
            in_specs=[
                # x: feature-major, tiled over the lane axis, auto double-buffered.
                pl.BlockSpec((d_in, tile_n), lambda i: (0, i)),
                # weight column: constant block index -> fetched once.
                pl.BlockSpec((d_in, 1), lambda i: (0, 0)),
                # bias: scalar in SMEM (no VMEM tile, no double buffer).
                pl.BlockSpec((1, 1), lambda i: (0, 0),
                             memory_space=pltpu.MemorySpace.SMEM),
            ],
            # Lane-dense output slab.
            out_specs=pl.BlockSpec((1, tile_n), lambda i: (0, i)),
        ),
        compiler_params=pltpu.CompilerParams(
            # Independent row tiles: shard across TensorCores on v7x.
            dimension_semantics=("parallel",),
            # Headroom above the 16/32 MiB default scoped limits while staying
            # safely inside v7x's 64 MiB physical VMEM.
            vmem_limit_bytes=48 * 1024 * 1024,
        ),
    )(x_t, w_col, b2d)

    # (1, N) -> (N, 1): contiguous data, no-copy reshape.
    return out.reshape(n, d_out)


if __name__ == "__main__":
    key = jax.random.PRNGKey(0)
    kx, kw, kb = jax.random.split(key, 3)

    D_IN, D_OUT = 13, 1
    # Deterministic init mimicking nn.Linear's uniform(-1/sqrt(13), 1/sqrt(13)).
    bound = 1.0 / (D_IN ** 0.5)
    weight = jax.random.uniform(kw, (D_OUT, D_IN), dtype=jnp.float32,
                                minval=-bound, maxval=bound)
    bias = jax.random.uniform(kb, (D_OUT,), dtype=jnp.float32,
                              minval=-bound, maxval=bound)

    ok = True
    # (n, tile_n): small Boston-style batch collapsing to one block, and a
    # multi-tile batch with a ragged tail (exercises the tiled grid + partial
    # last block on both the input and the lane-dense output slab).
    for n, tile in ((8, 65536), (1037, 256)):
        xk = jax.random.fold_in(kx, n)
        x = jax.random.normal(xk, (n, D_IN), dtype=jnp.float32)

        out = linear_forward(x, weight, bias, tile_n=tile)
        jax.block_until_ready(out)

        ref = x @ weight.T + bias        # plain-JAX nn.Linear semantics
        ok &= out.shape == (n, D_OUT)
        ok &= bool(jnp.allclose(out, ref, atol=1e-5, rtol=1e-5))

    assert ok
    print("KERNEL_OK")
</pallas_src>

<mosaic_0001>
module attributes {stable_mosaic.version = 11 : i64} {
  func.func @_linear_kernel(%arg0: i32, %arg1: memref<13x8xf32, #tpu.memory_space<vmem>>, %arg2: memref<13x1xf32, #tpu.memory_space<vmem>>, %arg3: memref<1x1xf32, #tpu.memory_space<smem>>, %arg4: memref<1x8xf32, #tpu.memory_space<vmem>>) attributes {dimension_semantics = [#tpu.dimension_semantics<parallel>], iteration_bounds = array<i64: 1>, scalar_prefetch = 0 : i64, scratch_operands = 0 : i64, tpu.core_type = #tpu.core_type<tc>, window_params = [{transform_indices = @transform_0, window_bounds = array<i64: 13, 8>}, {pipeline_mode = #tpu.pipeline_mode<synchronous>, transform_indices = @transform_1, window_bounds = array<i64: 13, 1>}, {transform_indices = @transform_2, window_bounds = array<i64: 1, 1>}, {transform_indices = @transform_3, window_bounds = array<i64: 1, 8>}]} {
    %c0 = arith.constant 0 : index
    %c0_0 = arith.constant 0 : index
    %0 = vector.load %arg1[%c0, %c0_0] : memref<13x8xf32, #tpu.memory_space<vmem>>, vector<13x8xf32>
    %c0_1 = arith.constant 0 : index
    %c0_2 = arith.constant 0 : index
    %1 = vector.load %arg2[%c0_1, %c0_2] : memref<13x1xf32, #tpu.memory_space<vmem>>, vector<13x1xf32>
    %c0_3 = arith.constant 0 : index
    %c0_4 = arith.constant 0 : index
    %2 = memref.load %arg3[%c0_3, %c0_4] : memref<1x1xf32, #tpu.memory_space<smem>>
    %3 = vector.broadcast %1 : vector<13x1xf32> to vector<13x8xf32>
    %4 = arith.mulf %0, %3 : vector<13x8xf32>
    %cst = arith.constant dense<0.000000e+00> : vector<8xf32>
    %5 = vector.multi_reduction <add>, %4, %cst [0] : vector<13x8xf32> to vector<8xf32>
    %6 = vector.shape_cast %5 : vector<8xf32> to vector<1x8xf32>
    %7 = vector.broadcast %2 : f32 to vector<1x8xf32>
    %8 = arith.addf %6, %7 : vector<1x8xf32>
    %c0_5 = arith.constant 0 : index
    %c0_6 = arith.constant 0 : index
    %9 = vector.load %arg4[%c0_5, %c0_6] : memref<1x8xf32, #tpu.memory_space<vmem>>, vector<1x8xf32>
    tpu.vector_store %arg4[%c0_5, %c0_6], %8 {strides = array<i32>} : memref<1x8xf32, #tpu.memory_space<vmem>>, vector<1x8xf32>,
    return
  }
  func.func @transform_0(%arg0: i32) -> (i32, i32) {
    %c0_i32 = arith.constant 0 : i32
    %c0_i32_0 = arith.constant 0 : i32
    return %c0_i32, %arg0 : i32, i32
  }
  func.func @transform_1(%arg0: i32) -> (i32, i32) {
    %c0_i32 = arith.constant 0 : i32
    %c0_i32_0 = arith.constant 0 : i32
    %c0_i32_1 = arith.constant 0 : i32
    return %c0_i32, %c0_i32_0 : i32, i32
  }
  func.func @transform_2(%arg0: i32) -> (i32, i32) {
    %c0_i32 = arith.constant 0 : i32
    %c0_i32_0 = arith.constant 0 : i32
    %c0_i32_1 = arith.constant 0 : i32
    return %c0_i32, %c0_i32_0 : i32, i32
  }
  func.func @transform_3(%arg0: i32) -> (i32, i32) {
    %c0_i32 = arith.constant 0 : i32
    %c0_i32_0 = arith.constant 0 : i32
    return %c0_i32, %arg0 : i32, i32
  }
}

</mosaic_0001>

<bundles_post_ra>
// kernel: tpu_custom_call.1
= control target key start
LH: loop header
LB: loop body
LE: loop exit
PB: predicated region body
PF: predicated region fallthrough
CT: control target
= control target key end

     0   :  { %v87_v1 = vmov 0   ;;  %s127_s0 = inlined_call_operand.vmem [shape: f32[13,8], index: 0, kind: input, shape index: {}]   ;;  %s128_s1 = inlined_call_operand.vmem [shape: f32[13,1], index: 1, kind: input, shape index: {}]   ;;  %s129_s2 = inlined_call_operand.<no memory space> [shape: f32[1,1], index: 2, kind: input, shape index: {}]   ;;  %s130_s3 = inlined_call_operand.hbm [shape: f32[1,8], index: 3, kind: output, shape index: {}]  }
   0x1   :  { %v18_v0 = vld [vmem:[%s128_s1] sm:$0xff]  ;;  %64 = vset.pattern.permute.xlu0 %v87_v1 }
   0x2   :  { %9 = vsyncpa [#allocation4], 0  ;;  %23 = vperm.xlu0 %64, %v18_v0   ;;  %v19_v2 = vld [vmem:[%s128_s1 + $0x8] sm:$0x1f]  ;;  %v16_v4 = vld [vmem:[%s127_s0] sm:$0xff]  ;;  %vm33_vm0 = vcmask 64512   ;;  %v44_v17 = vstv %s129_s2 }
   0x3   :  { %v17_v5 = vld [vmem:[%s127_s0 + $0x8] sm:$0x1f]  ;;  %vm35_vm1 = vcmask 61440   ;;  %s88_s21 = smov [#allocation3]   ;;  %vm46_vm2 = vcmask 57344  }
   0x4   :  { %s54_s22 = sshll.u32 %s88_s21, 4  ;;  %s55_s22 = int_to_ptr.vmem [resolvable:$true] %s54_s22 }
   0x5   :  { %s65_s0 = scalar_lea.vmem %s55_s22, 16  ;;  %s69_s23 = scalar_lea.vmem %s55_s22, 32 }
   0x6   :  { %28 = vperm.xlu0 %64, %v19_v2   ;;  %p66_p0 = scmp.ne.s32.totalorder %s55_s22, %s65_s0  ;;  %p70_p1 = scmp.lt.s32.totalorder %s55_s22, %s55_s22 }
   0x7   :  { %p71_p2 = scmp.lt.s32.totalorder %s69_s23, %s65_s0 }
   0x9   :  { %p72_p3 = por %p71_p2, %p70_p1 }
   0xb   :  { %p73_p4 = pnand %p72_p3, %p66_p0 }
  0x7d   :  { %v24_v3 = vpop.permute.xlu0 %23 }
  0x7e   :  { %v31_v6 = vmul.f32 %v24_v3, %v16_v4 }
  0x80   :  { %v34_v9 = vsel %vm33_vm0, %v31_v6, 0.0 }
  0x81   :  { %v29_v7 = vpop.permute.xlu0 %28 }
  0x82   :  { %v32_v8 = vmul.f32 %v29_v7, %v17_v5 }
  0x84   :  { %v36_v10 = vsel %vm35_vm1, %v32_v8, 0.0 }
  0x85   :  { %v37_v11 = vadd.f32 %v36_v10, %v34_v9 }
  0x87   :  { %v38_v12 = vrot.slane %v37_v11, 4 }
  0x89   :  { %v39_v13 = vadd.f32 %v38_v12, %v37_v11 }
  0x8b   :  { %v40_v14 = vrot.slane %v39_v13, 2 }
  0x8d   :  { %v41_v15 = vadd.f32 %v40_v14, %v39_v13 }
  0x8f   :  { %v42_v16 = vrot.slane %v41_v15, 1 }
  0x91   :  { %v43_v18 = vadd.f32 %v42_v16, %v41_v15 }
  0x93   :  { %v45_v19 = vadd.f32 %v44_v17, %v43_v18 }
  0x95   :  { %47 = vst.msk [vmem:[#allocation3] sm:$0x1] %vm46_vm2, %v45_v19 }
  0x96   :  { %76 = shalt.err (!%p73_p4)
}
  0x97   :  { %57 = dma.vmem_to_hbm [thread:$0]  %s55_s22, 16, %s130_s3, [#allocation4]  }
  0x98   :  { %85 = dma.done.wait [#allocation4], 16  }
  0x99   :  { %86 = vsyncadd [#allocation4], 4294967280 }
  0x9a   :  { %61 = vsyncpa [#allocation4], 1 }

</bundles_post_ra>
